<compile_context>
chip_gen: v5e
topology: v5e:2x2
jax: 0.10.0
libtpu: 0.0.40
codegen_flags: <defaults>
</compile_context>

<pallas_src>
import math

import jax
import jax.numpy as jnp
from jax.experimental import pallas as pl
from jax.experimental.pallas import tpu as pltpu

_TM_MAX = 8192  # rows of x1 handled per grid step


def _linear_sub_kernel(x1_ref, w_ref, b_ref, x2_ref, o_ref):
    # (TM, K) @ (K, N) on the MXU with f32 accumulation, then fused bias add
    # and elementwise subtract; single store of the output tile.
    acc = jnp.dot(x1_ref[...], w_ref[...], preferred_element_type=jnp.float32)
    o_ref[...] = (acc + b_ref[...] - x2_ref[...]).astype(o_ref.dtype)


@jax.jit
def linear_sub(x1, x2, weight, bias):
    """out = x1 @ weight.T + bias - x2  (torch.nn.Linear semantics).

    x1:     (..., K)  with K == weight.shape[1]
    x2:     (..., N)  broadcast-compatible with the linear output
    weight: (N, K)    (PyTorch Linear layout)
    bias:   (N,)
    """
    N, K = weight.shape
    assert x1.shape[-1] == K, "x1 last dim must equal Linear in_features"

    lead = jnp.broadcast_shapes(x1.shape[:-1], x2.shape[:-1])
    # Only materialize a broadcast if one is actually required (the module's
    # forward uses matching shapes, so this path is a no-op).
    # TODO(synk): express a genuine leading-dim broadcast via the BlockSpec
    # index_map instead of materializing it in HBM.
    if x1.shape[:-1] != lead:
        x1 = jnp.broadcast_to(x1, lead + (K,))
    if x2.shape[:-1] != lead:
        x2 = jnp.broadcast_to(x2, lead + (N,))

    out_dtype = jnp.result_type(x1.dtype, weight.dtype, bias.dtype, x2.dtype)
    compute_dtype = jnp.result_type(x1.dtype, weight.dtype)

    M = 1
    for d in lead:
        M *= d

    # Leading-dim collapse only (same row order, last dim unchanged) — cheap.
    x1_2d = x1.reshape(M, K).astype(compute_dtype)
    x2_2d = x2.reshape(M, N).astype(out_dtype)
    w_t = weight.T.astype(compute_dtype)   # (K, N), tiny (64x8)
    b_2d = bias.reshape(1, N).astype(out_dtype)

    # Row-tile size: sublane multiple, big enough to amortize per-step
    # pipeline overhead, capped at ceil(M/2) so the "parallel" grid has >=2
    # steps (keeps both v7x TensorCores busy; harmless on v5e/v6e).
    if M % 8 == 0 and M >= 16:
        tm = min(_TM_MAX, ((pl.cdiv(M, 2) + 7) // 8) * 8)
    else:
        tm = M  # single full-extent block (satisfies the (8,128) rule)
    grid = (pl.cdiv(M, tm),)

    out_2d = pl.pallas_call(
        _linear_sub_kernel,
        out_shape=jax.ShapeDtypeStruct((M, N), out_dtype),
        grid=grid,
        in_specs=[
            pl.BlockSpec((tm, K), lambda i: (i, 0)),   # x1 row tile
            pl.BlockSpec((K, N), lambda i: (0, 0)),    # weight (VMEM-resident)
            pl.BlockSpec((1, N), lambda i: (0, 0)),    # bias   (VMEM-resident)
            pl.BlockSpec((tm, N), lambda i: (i, 0)),   # x2 row tile
        ],
        out_specs=pl.BlockSpec((tm, N), lambda i: (i, 0)),
        compiler_params=pltpu.CompilerParams(
            dimension_semantics=("parallel",),
            vmem_limit_bytes=40 * 1024 * 1024,
        ),
    )(x1_2d, w_t, b_2d, x2_2d)

    return out_2d.reshape(lead + (N,))


if __name__ == "__main__":
    key = jax.random.PRNGKey(0)
    k1, k2, k3, k4 = jax.random.split(key, 4)

    IN_FEATURES, OUT_FEATURES = 64, 8

    # Deterministic "Linear(64, 8)" parameters (synthetic, Kaiming-ish scale).
    bound = 1.0 / math.sqrt(IN_FEATURES)
    weight = jax.random.uniform(
        k1, (OUT_FEATURES, IN_FEATURES), jnp.float32, -bound, bound)
    bias = jax.random.uniform(k2, (OUT_FEATURES,), jnp.float32, -bound, bound)

    # Inputs consistent with the forward pass: x1 last dim must be 64 (the
    # Linear in_features), x2 must match the linear output (last dim 8).
    x1 = jax.random.normal(k3, (1, 8, 16, IN_FEATURES), jnp.float32)
    x2 = jax.random.normal(k4, (1, 8, 16, OUT_FEATURES), jnp.float32)

    out = jax.block_until_ready(linear_sub(x1, x2, weight, bias))

    # Reference check in plain JAX.
    ref = jnp.einsum("...k,nk->...n", x1, weight) + bias - x2
    assert out.shape == ref.shape
    assert jnp.allclose(out, ref, atol=1e-4, rtol=1e-4), "mismatch vs reference"

    print("KERNEL_OK")
</pallas_src>

<mosaic_0001>
module attributes {stable_mosaic.version = 11 : i64} {
  func.func @_linear_sub_kernel(%arg0: i32, %arg1: memref<64x64xf32, #tpu.memory_space<vmem>>, %arg2: memref<64x8xf32, #tpu.memory_space<vmem>>, %arg3: memref<1x8xf32, #tpu.memory_space<vmem>>, %arg4: memref<64x8xf32, #tpu.memory_space<vmem>>, %arg5: memref<64x8xf32, #tpu.memory_space<vmem>>) attributes {dimension_semantics = [#tpu.dimension_semantics<parallel>], iteration_bounds = array<i64: 2>, scalar_prefetch = 0 : i64, scratch_operands = 0 : i64, tpu.core_type = #tpu.core_type<tc>, window_params = [{transform_indices = @transform_0, window_bounds = array<i64: 64, 64>}, {pipeline_mode = #tpu.pipeline_mode<synchronous>, transform_indices = @transform_1, window_bounds = array<i64: 64, 8>}, {pipeline_mode = #tpu.pipeline_mode<synchronous>, transform_indices = @transform_2, window_bounds = array<i64: 1, 8>}, {transform_indices = @transform_3, window_bounds = array<i64: 64, 8>}, {transform_indices = @transform_4, window_bounds = array<i64: 64, 8>}]} {
    %c0 = arith.constant 0 : index
    %c0_0 = arith.constant 0 : index
    %0 = vector.load %arg1[%c0, %c0_0] : memref<64x64xf32, #tpu.memory_space<vmem>>, vector<64x64xf32>
    %c0_1 = arith.constant 0 : index
    %c0_2 = arith.constant 0 : index
    %1 = vector.load %arg2[%c0_1, %c0_2] : memref<64x8xf32, #tpu.memory_space<vmem>>, vector<64x8xf32>
    %cst = arith.constant dense<0.000000e+00> : vector<64x8xf32>
    %2 = tpu.matmul %0, %1, %cst {dimension_numbers = #tpu.dot_dimension_numbers<[1], [0], [0], [1], [0, 0, 1, 1], [], []>} : vector<64x64xf32>, vector<64x8xf32>, vector<64x8xf32> -> vector<64x8xf32>
    %c0_3 = arith.constant 0 : index
    %c0_4 = arith.constant 0 : index
    %3 = vector.load %arg3[%c0_3, %c0_4] : memref<1x8xf32, #tpu.memory_space<vmem>>, vector<1x8xf32>
    %4 = vector.broadcast %3 : vector<1x8xf32> to vector<64x8xf32>
    %5 = arith.addf %2, %4 : vector<64x8xf32>
    %c0_5 = arith.constant 0 : index
    %c0_6 = arith.constant 0 : index
    %6 = vector.load %arg4[%c0_5, %c0_6] : memref<64x8xf32, #tpu.memory_space<vmem>>, vector<64x8xf32>
    %7 = arith.subf %5, %6 : vector<64x8xf32>
    %c0_7 = arith.constant 0 : index
    %c0_8 = arith.constant 0 : index
    %8 = vector.load %arg5[%c0_7, %c0_8] : memref<64x8xf32, #tpu.memory_space<vmem>>, vector<64x8xf32>
    tpu.vector_store %arg5[%c0_7, %c0_8], %7 {strides = array<i32>} : memref<64x8xf32, #tpu.memory_space<vmem>>, vector<64x8xf32>,
    return
  }
  func.func @transform_0(%arg0: i32) -> (i32, i32) {
    %c0_i32 = arith.constant 0 : i32
    %c0_i32_0 = arith.constant 0 : i32
    return %arg0, %c0_i32 : i32, i32
  }
  func.func @transform_1(%arg0: i32) -> (i32, i32) {
    %c0_i32 = arith.constant 0 : i32
    %c0_i32_0 = arith.constant 0 : i32
    %c0_i32_1 = arith.constant 0 : i32
    return %c0_i32, %c0_i32_0 : i32, i32
  }
  func.func @transform_2(%arg0: i32) -> (i32, i32) {
    %c0_i32 = arith.constant 0 : i32
    %c0_i32_0 = arith.constant 0 : i32
    %c0_i32_1 = arith.constant 0 : i32
    return %c0_i32, %c0_i32_0 : i32, i32
  }
  func.func @transform_3(%arg0: i32) -> (i32, i32) {
    %c0_i32 = arith.constant 0 : i32
    %c0_i32_0 = arith.constant 0 : i32
    return %arg0, %c0_i32 : i32, i32
  }
  func.func @transform_4(%arg0: i32) -> (i32, i32) {
    %c0_i32 = arith.constant 0 : i32
    %c0_i32_0 = arith.constant 0 : i32
    return %arg0, %c0_i32 : i32, i32
  }
}

</mosaic_0001>

<bundles_post_ra>
// kernel: linear_sub.1
= control target key start
LH: loop header
LB: loop body
LE: loop exit
PB: predicated region body
PF: predicated region fallthrough
CT: control target
= control target key end

     0   :  { %s489_s15 = smov 0   ;;  %s577_s0 = inlined_call_operand.vmem [shape: f32[128,64], index: 0, kind: input, shape index: {}]   ;;  %s578_s1 = inlined_call_operand.vmem [shape: f32[64,8], index: 1, kind: input, shape index: {}]   ;;  %s579_s2 = inlined_call_operand.vmem [shape: f32[1,8], index: 2, kind: input, shape index: {}]   ;;  %s580_s3 = inlined_call_operand.vmem [shape: f32[128,8], index: 3, kind: input, shape index: {}]   ;;  %s581_s4 = inlined_call_operand.vmem [shape: f32[128,8], index: 4, kind: output, shape index: {}]  }
   0x1 LB: > { %s402_s16 = sadd.s32 4294967295, %s462_s15   ;;  %p406_p0 = scmp.ge.s32.totalorder %s462_s15, 1  ;;  %s462_s15 = sphi %s489_s15, %s14_s15  }
   0x2   : > { %p174_p1 = scmp.lt.s32.totalorder %s462_s15, 3 }
   0x4   : > { %p175_p2 = pnand %p406_p0, %p174_p1 }
   0x5   : > { %s407_s21 = sshll.u32 (!%p175_p2), %s402_s16, 3 }
   0x6   : > { %178 = sbr.rel (%p175_p2) target bundleno = 173 (0xad), region = 36  ;;  %p206_p3 = scmp.lt.s32.totalorder (!%p175_p2), %s407_s21, 15 }
   0xb   : > { %v238_v0 = vld [vmem:[%s578_s1 + $0x38] sm:$0xff]  ;;  %v237_v1 = vld [vmem:[%s578_s1 + $0x30] sm:$0xff]  ;;  %v236_v2 = vld [vmem:[%s578_s1 + $0x28] sm:$0xff]  ;;  %s583_s21 = smov (!%p206_p3, %s407_s21), 15  ;;  %vm243_vm0 = vcmask 523264   ;;  %vm325_vm1 = vcmask 64512  }
   0xc   : > { %424 = vmatpush.msra.mxu2 %v238_v0  ;;  %425 = vmatpush.msra.mxu3 %v238_v0  ;;  %v235_v3 = vld [vmem:[%s578_s1 + $0x20] sm:$0xff]  ;;  %v234_v4 = vld [vmem:[%s578_s1 + $0x18] sm:$0xff]  ;;  %s512_s28 = sshll.u32 %s583_s21, 3  ;;  %v233_v5 = vld [vmem:[%s578_s1 + $0x10] sm:$0xff] }
   0xd   : > { %276 = vmatpush.msra.mxu0 %v238_v0  ;;  %423 = vmatpush.msra.mxu1 %v238_v0  ;;  %v232_v6 = vld [vmem:[%s578_s1 + $0x8] sm:$0xff]  ;;  %s209_s9 = scalar_lea.vmem %s577_s0, %s512_s28  ;;  %v231_v7 = vld [vmem:[%s578_s1] sm:$0xff]  ;;  %s539_s14 = scalar_lea.vmem %s580_s3, %s512_s28 }
   0xe   : > { %427 = vmatpush.msra.mxu2 %v237_v1  ;;  %428 = vmatpush.msra.mxu3 %v237_v1  ;;  %v227_v8 = vld [vmem:[%s209_s9 + $0x20] sm:$0xff]  ;;  %v229_v9 = vld [vmem:[%s209_s9 + $0x30] sm:$0xff]  ;;  %v228_v12 = vld [vmem:[%s209_s9 + $0x28] sm:$0xff]  ;;  %s550_s20 = scalar_lea.vmem %s581_s4, %s512_s28 }
   0xf   : > { %277 = vmatpush.msra.mxu0 %v237_v1  ;;  %426 = vmatpush.msra.mxu1 %v237_v1  ;;  %v223_v10 = vld [vmem:[%s209_s9] sm:$0xff]  ;;  %v225_v11 = vld [vmem:[%s209_s9 + $0x10] sm:$0xff]  ;;  %v230_v13 = vld [vmem:[%s209_s9 + $0x38] sm:$0xff] }
  0x10   : > { %430 = vmatpush.msra.mxu2 %v236_v2  ;;  %431 = vmatpush.msra.mxu3 %v236_v2  ;;  %v224_v14 = vld [vmem:[%s209_s9 + $0x8] sm:$0xff]  ;;  %v226_v15 = vld [vmem:[%s209_s9 + $0x18] sm:$0xff]  ;;  %v455_v16 = vld [vmem:[%s579_s2] ss:$0 sm:$0xff] }
  0x11   : > { %278 = vmatpush.msra.mxu0 %v236_v2  ;;  %429 = vmatpush.msra.mxu1 %v236_v2  ;;  %v309_v18 = vld [vmem:[%s539_s14] sm:$0xff]  ;;  %v311_v20 = vld [vmem:[%s539_s14 + $0x10] sm:$0xff]  ;;  %v310_v34 = vld [vmem:[%s539_s14 + $0x8] sm:$0xff] }
  0x12   : > { %433 = vmatpush.msra.mxu2 %v235_v3  ;;  %434 = vmatpush.msra.mxu3 %v235_v3  ;;  %v313_v26 = vld [vmem:[%s539_s14 + $0x20] sm:$0xff]  ;;  %v315_v28 = vld [vmem:[%s539_s14 + $0x30] sm:$0xff]  ;;  %v312_v36 = vld [vmem:[%s539_s14 + $0x18] sm:$0xff] }
  0x13   : > { %279 = vmatpush.msra.mxu0 %v235_v3  ;;  %432 = vmatpush.msra.mxu1 %v235_v3  ;;  %v314_v42 = vld [vmem:[%s539_s14 + $0x28] sm:$0xff]  ;;  %v316_v44 = vld [vmem:[%s539_s14 + $0x38] sm:$0xff] }
  0x14   : > { %436 = vmatpush.msra.mxu2 %v234_v4  ;;  %437 = vmatpush.msra.mxu3 %v234_v4 }
  0x15   : > { %280 = vmatpush.msra.mxu0 %v234_v4  ;;  %435 = vmatpush.msra.mxu1 %v234_v4 }
  0x16   : > { %439 = vmatpush.msra.mxu2 %v233_v5  ;;  %440 = vmatpush.msra.mxu3 %v233_v5 }
  0x17   : > { %281 = vmatpush.msra.mxu0 %v233_v5  ;;  %438 = vmatpush.msra.mxu1 %v233_v5 }
  0x18   : > { %442 = vmatpush.msra.mxu2 %v232_v6  ;;  %443 = vmatpush.msra.mxu3 %v232_v6 }
  0x19   : > { %282 = vmatpush.msra.mxu0 %v232_v6  ;;  %441 = vmatpush.msra.mxu1 %v232_v6 }
  0x1a   : > { %445 = vmatpush.msra.mxu2 %v231_v7  ;;  %446 = vmatpush.msra.mxu3 %v231_v7 }
  0x1b   : > { %417 = vmatmul.msk.f32.vlgmr.msra.gmra.mxu2 %vm243_vm0, %v227_v8  ;;  %419 = vmatmul.msk.f32.vlgmr.msra.gmra.mxu3 %vm243_vm0, %v229_v9 }
  0x1c   : > { %283 = vmatpush.msra.mxu0 %v231_v7  ;;  %444 = vmatpush.msra.mxu1 %v231_v7 }
  0x1d   : > { %413 = vmatmul.msk.f32.vlgmr.msra.gmra.mxu0 %vm243_vm0, %v223_v10  ;;  %415 = vmatmul.msk.f32.vlgmr.msra.gmra.mxu1 %vm243_vm0, %v225_v11 }
  0x23   : > { %418 = vmatmul.msk.f32.gmra.mxu2 %vm243_vm0, %v228_v12  ;;  %420 = vmatmul.msk.f32.gmra.mxu3 %vm243_vm0, %v230_v13 }
  0x25   : > { %414 = vmatmul.msk.f32.gmra.mxu0 %vm243_vm0, %v224_v14  ;;  %416 = vmatmul.msk.f32.gmra.mxu1 %vm243_vm0, %v226_v15 }
  0x9a   : > { %v285_v17 = vpop.f32.mrf.mxu0  ;;  %v291_v19 = vpop.f32.mrf.mxu1 }
  0x9b   : > { %v286_v21 = vadd.f32 %v455_v16, %v285_v17  ;;  %v292_v22 = vadd.f32 %v455_v16, %v291_v19 }
  0x9d   : > { %v317_v23 = vsub.f32 %v286_v21, %v309_v18  ;;  %v319_v24 = vsub.f32 %v292_v22, %v311_v20 }
  0x9e   : > { %v297_v25 = vpop.f32.mrf.mxu2  ;;  %v303_v27 = vpop.f32.mrf.mxu3 }
  0x9f   : > { %326 = vst.msk [vmem:[%s550_s20] sm:$0xff] %vm325_vm1, %v317_v23  ;;  %v298_v29 = vadd.f32 %v455_v16, %v297_v25  ;;  %v304_v30 = vadd.f32 %v455_v16, %v303_v27 }
  0xa0   : > { %328 = vst.msk [vmem:[%s550_s20 + $0x10] sm:$0xff] %vm325_vm1, %v319_v24 }
  0xa1   : > { %v321_v31 = vsub.f32 %v298_v29, %v313_v26  ;;  %v323_v32 = vsub.f32 %v304_v30, %v315_v28 }
  0xa2   : > { %v288_v33 = vpop.f32.mrf.mxu0  ;;  %v294_v35 = vpop.f32.mrf.mxu1 }
  0xa3   : > { %330 = vst.msk [vmem:[%s550_s20 + $0x20] sm:$0xff] %vm325_vm1, %v321_v31  ;;  %v289_v37 = vadd.f32 %v455_v16, %v288_v33  ;;  %v295_v38 = vadd.f32 %v455_v16, %v294_v35 }
  0xa4   : > { %332 = vst.msk [vmem:[%s550_s20 + $0x30] sm:$0xff] %vm325_vm1, %v323_v32 }
  0xa5   : > { %v318_v39 = vsub.f32 %v289_v37, %v310_v34  ;;  %v320_v40 = vsub.f32 %v295_v38, %v312_v36 }
  0xa6   : > { %v300_v41 = vpop.f32.mrf.mxu2  ;;  %v306_v43 = vpop.f32.mrf.mxu3 }
  0xa7   : > { %327 = vst.msk [vmem:[%s550_s20 + $0x8] sm:$0xff] %vm325_vm1, %v318_v39  ;;  %v301_v45 = vadd.f32 %v455_v16, %v300_v41  ;;  %v307_v46 = vadd.f32 %v455_v16, %v306_v43 }
  0xa8   : > { %329 = vst.msk [vmem:[%s550_s20 + $0x18] sm:$0xff] %vm325_vm1, %v320_v40 }
  0xa9   : > { %v322_v47 = vsub.f32 %v301_v45, %v314_v42  ;;  %v324_v48 = vsub.f32 %v307_v46, %v316_v44 }
  0xab   : > { %331 = vst.msk [vmem:[%s550_s20 + $0x28] sm:$0xff] %vm325_vm1, %v322_v47 }
  0xac   : > { %333 = vst.msk [vmem:[%s550_s20 + $0x38] sm:$0xff] %vm325_vm1, %v324_v48 }
  0xad PF: > { %s14_s15 = sadd.s32 1, %s462_s15  }
  0xae   : > { %p11_p4 = scmp.ge.s32.totalorder %s14_s15, 4  }
  0xb0   :  { %13 = sbr.rel (!%p11_p4) target bundleno = 1 (0x1), region = 69 }

</bundles_post_ra>
